<compile_context>
chip_gen: v6e
topology: v6e:2x2x1
jax: 0.10.0
libtpu: 0.0.40
codegen_flags: <defaults>
</compile_context>

<pallas_src>
import functools

import jax
import jax.numpy as jnp
from jax.experimental import pallas as pl
from jax.experimental.pallas import tpu as pltpu


def _groupnorm_kernel(x_ref, w_ref, b_ref, o_ref, *, eps, inv_d, inv_dm1, cg, hwp):
    """One (group-block, batch) tile.

    x_ref : (1, 1, Gt, Cg*HWp)  one sublane row per group, spatial+channel on lanes
    w_ref : (1, Gt, Cg)         per-channel affine scale
    b_ref : (1, Gt, Cg)         per-channel affine shift
    o_ref : (1, 1, Gt, Cg*HWp)  output block
    """
    gt = x_ref.shape[2]

    # ---- pass 1: per-group sum / sum-of-squares (exact f32 lane reduces).
    # Streamed one HWp chunk at a time so no full-tile value stays live.
    s = jnp.zeros((gt, 1), jnp.float32)
    ss = jnp.zeros((gt, 1), jnp.float32)
    for c in range(cg):  # static unroll; Cg is small for GroupNorm configs
        xc = x_ref[0, 0, :, c * hwp:(c + 1) * hwp].astype(jnp.float32)  # (Gt, HWp)
        s = s + jnp.sum(xc, axis=-1, keepdims=True)
        ss = ss + jnp.sum(xc * xc, axis=-1, keepdims=True)

    mean = s * inv_d                                        # (Gt, 1)
    # unbiased variance (torch.Tensor.var default, divide by n-1); clamp so the
    # single-pass estimate can never go (slightly) negative and NaN the rsqrt.
    var = jnp.maximum((ss - s * mean) * inv_dm1, 0.0)       # (Gt, 1)
    inv_std = jax.lax.rsqrt(var + eps)                      # (Gt, 1)

    # ---- pass 2: fold the per-channel affine into scale/shift and apply it
    # with one fused mul+add per lane-aligned chunk, re-reading x from VMEM.
    w = w_ref[0].astype(jnp.float32)                        # (Gt, Cg)
    b = b_ref[0].astype(jnp.float32)
    for c in range(cg):
        scale = w[:, c:c + 1] * inv_std                     # (Gt, 1)
        shift = b[:, c:c + 1] - mean * scale                # (Gt, 1)
        xc = x_ref[0, 0, :, c * hwp:(c + 1) * hwp].astype(jnp.float32)
        o_ref[0, 0, :, c * hwp:(c + 1) * hwp] = (xc * scale + shift).astype(o_ref.dtype)


def _sublane_tile(itemsize):
    # (8, 128) tiling is per 32-bit word: f32 -> 8 sublanes, bf16 -> 16, int8 -> 32.
    return 8 * max(1, 4 // int(itemsize))


def _detected_vmem_bytes(default=128 << 20):
    """Best-effort per-core VMEM capacity (64 MiB on v7x, 128 MiB on v5e/v6e)."""
    try:
        info = pltpu.get_tpu_info()
        for attr in ("vmem_capacity_bytes", "vmem_size_bytes", "vmem_bytes"):
            v = getattr(info, attr, None)
            if v:
                return int(v)
    except Exception:
        pass
    return default


def _choose_group_tile(N, G, lane_elems, itemsize, target_bytes, min_steps=8):
    """Pick Gt (groups per block).

    lane_elems = Cg * HWp, one full group's elements on the lane axis.
    Prefers Gt that is a multiple of the sublane tile (fully occupied vregs),
    caps the padded block at `target_bytes`, and shrinks Gt so the grid keeps
    >= min_steps steps (>= ~4 per TensorCore with 2 TCs on v7x) for small N.
    """
    sub = _sublane_tile(itemsize)

    def block_bytes(gt):
        return (-(-gt // sub) * sub) * lane_elems * itemsize

    divisors = [d for d in range(1, G + 1) if G % d == 0]
    fitting = [d for d in divisors if block_bytes(d) <= target_bytes]
    if not fitting:
        # Even a single group exceeds the budget; fall back to one group per
        # block and let the caller raise vmem_limit_bytes from the footprint.
        # TODO(synk): for truly giant groups (Cg*HW block near the VMEM cap),
        # split HW over an extra "arbitrary" grid axis with VMEM scratch
        # accumulators and a pl.when finalize pass instead of one huge block.
        return 1
    dense = [d for d in fitting if d % sub == 0]
    pool = dense if dense else fitting
    gt = max(pool)
    while N * (G // gt) < min_steps:
        smaller = [d for d in pool if d < gt]
        if not smaller:
            break
        gt = max(smaller)
    return gt


def group_norm_2d(x, weight, bias, num_groups=16, eps=1e-5):
    """Forward pass of the PyTorch GroupNorm2D module.

    x: (N, C, H, W); weight/bias: (1, C, 1, 1).  Uses the unbiased variance
    (x.var(-1) in the reference module).
    """
    N, C, H, W = x.shape
    G = num_groups
    assert C % G == 0
    Cg = C // G
    HW = H * W
    D = Cg * HW                          # reduction size per group
    HWp = -(-HW // 128) * 128            # lane-dense spatial axis (zero padded)
    lane_elems = Cg * HWp

    itemsize = jnp.dtype(x.dtype).itemsize
    vmem_cap = _detected_vmem_bytes()
    # Larger blocks amortize the ~0.35 us/step overhead; keep them slightly
    # smaller on v7x (64 MiB physical VMEM) than on v5e/v6e (128 MiB).
    target_bytes = (6 << 20) if vmem_cap >= (96 << 20) else (4 << 20)

    Gt = _choose_group_tile(N, G, lane_elems, itemsize, target_bytes)
    Gb = G // Gt

    # Layout glue (plain XLA reshapes; the pad is the only copy and only runs
    # when HW is not already a multiple of 128).  Zero padding contributes
    # nothing to the sums, so the kernel needs no lane mask.
    x_r = x.reshape(N, C, HW)
    if HWp != HW:
        x_r = jnp.pad(x_r, ((0, 0), (0, 0), (0, HWp - HW)))
    x_r = x_r.reshape(N, Gb, Gt, lane_elems)
    w_r = weight.reshape(Gb, Gt, Cg).astype(jnp.float32)
    b_r = bias.reshape(Gb, Gt, Cg).astype(jnp.float32)

    # Explicit VMEM budget: double-buffered x/out blocks + resident w/b blocks.
    sub = _sublane_tile(itemsize)
    xo_block = (-(-Gt // sub) * sub) * lane_elems * itemsize
    wb_block = (-(-Gt // 8) * 8) * (-(-Cg // 128) * 128) * 4
    footprint = 4 * xo_block + 4 * wb_block + (2 << 20)
    vmem_limit = int(min(max(footprint, 16 << 20), max(vmem_cap // 2, 16 << 20)))

    inv_d = 1.0 / float(D)
    inv_dm1 = 1.0 / float(max(D - 1, 1))   # torch var is nan for D == 1 anyway

    kernel = functools.partial(
        _groupnorm_kernel, eps=float(eps), inv_d=inv_d, inv_dm1=inv_dm1,
        cg=Cg, hwp=HWp)

    out = pl.pallas_call(
        kernel,
        out_shape=jax.ShapeDtypeStruct((N, Gb, Gt, lane_elems), x.dtype),
        grid_spec=pltpu.PrefetchScalarGridSpec(
            num_scalar_prefetch=0,
            # n is the inner (fastest) axis: the w/b block index depends only
            # on g, so Pallas skips their re-DMA across the inner loop.
            grid=(Gb, N),
            in_specs=[
                pl.BlockSpec((1, 1, Gt, lane_elems), lambda g, n: (n, g, 0, 0)),
                pl.BlockSpec((1, Gt, Cg), lambda g, n: (g, 0, 0)),
                pl.BlockSpec((1, Gt, Cg), lambda g, n: (g, 0, 0)),
            ],
            out_specs=pl.BlockSpec((1, 1, Gt, lane_elems), lambda g, n: (n, g, 0, 0)),
        ),
        compiler_params=pltpu.CompilerParams(
            dimension_semantics=("parallel", "parallel"),
            vmem_limit_bytes=vmem_limit,
        ),
    )(x_r, w_r, b_r)

    out = out.reshape(N, C, HWp)
    if HWp != HW:
        out = out[:, :, :HW]
    return out.reshape(N, C, H, W)


def group_norm_2d_ref(x, weight, bias, num_groups=16, eps=1e-5):
    """Pure-JAX reference mirroring the PyTorch forward exactly."""
    N, C, H, W = x.shape
    G = num_groups
    xr = x.reshape(N, G, -1)
    mean = jnp.mean(xr, axis=-1, keepdims=True)
    var = jnp.sum((xr - mean) ** 2, axis=-1, keepdims=True) / (xr.shape[-1] - 1)
    xn = (xr - mean) / jnp.sqrt(var + eps)
    return xn.reshape(N, C, H, W) * weight + bias


if __name__ == "__main__":
    key = jax.random.PRNGKey(0)
    kx, kw, kb, kx2 = jax.random.split(key, 4)

    # Small shapes consistent with the module (num_groups=16 -> C % 16 == 0).
    N, C, H, W = 2, 32, 16, 16
    G = 16
    x = jax.random.normal(kx, (N, C, H, W), dtype=jnp.float32)
    # Module init is weight=1, bias=0; perturb deterministically so the folded
    # per-channel affine path is actually exercised.
    weight = 1.0 + 0.1 * jax.random.normal(kw, (1, C, 1, 1), dtype=jnp.float32)
    bias = 0.1 * jax.random.normal(kb, (1, C, 1, 1), dtype=jnp.float32)

    out = jax.block_until_ready(group_norm_2d(x, weight, bias, num_groups=G, eps=1e-5))
    ref = group_norm_2d_ref(x, weight, bias, num_groups=G, eps=1e-5)
    assert out.shape == (N, C, H, W)
    assert jnp.allclose(out, ref, atol=1e-5, rtol=1e-5), "mismatch vs reference"

    # Also exercise the lane-padded path (HW = 49, not a multiple of 128).
    x2 = jax.random.normal(kx2, (1, 32, 7, 7), dtype=jnp.float32)
    out2 = jax.block_until_ready(group_norm_2d(x2, weight, bias, num_groups=G, eps=1e-5))
    ref2 = group_norm_2d_ref(x2, weight, bias, num_groups=G, eps=1e-5)
    assert jnp.allclose(out2, ref2, atol=1e-5, rtol=1e-5), "mismatch vs reference (padded HW)"

    print("KERNEL_OK")
</pallas_src>

<mosaic_0001>
module attributes {stable_mosaic.version = 11 : i64} {
  func.func @_groupnorm_kernel(%arg0: i32, %arg1: i32, %arg2: memref<1x1x8x512xf32, #tpu.memory_space<vmem>>, %arg3: memref<1x8x2xf32, #tpu.memory_space<vmem>>, %arg4: memref<1x8x2xf32, #tpu.memory_space<vmem>>, %arg5: memref<1x1x8x512xf32, #tpu.memory_space<vmem>>) attributes {dimension_semantics = [#tpu.dimension_semantics<parallel>, #tpu.dimension_semantics<parallel>], iteration_bounds = array<i64: 2, 2>, scalar_prefetch = 0 : i64, scratch_operands = 0 : i64, tpu.core_type = #tpu.core_type<tc>, window_params = [{transform_indices = @transform_0, window_bounds = array<i64: 1, 1, 8, 512>}, {transform_indices = @transform_1, window_bounds = array<i64: 1, 8, 2>}, {transform_indices = @transform_2, window_bounds = array<i64: 1, 8, 2>}, {transform_indices = @transform_3, window_bounds = array<i64: 1, 1, 8, 512>}]} {
    %cst = arith.constant 0.000000e+00 : f32
    %0 = vector.broadcast %cst : f32 to vector<8x1xf32>
    %cst_0 = arith.constant 0.000000e+00 : f32
    %1 = vector.broadcast %cst_0 : f32 to vector<8x1xf32>
    %c0 = arith.constant 0 : index
    %c0_1 = arith.constant 0 : index
    %c0_2 = arith.constant 0 : index
    %c0_3 = arith.constant 0 : index
    %2 = vector.load %arg2[%c0, %c0_1, %c0_2, %c0_3] : memref<1x1x8x512xf32, #tpu.memory_space<vmem>>, vector<1x1x8x256xf32>
    %3 = vector.shape_cast %2 : vector<1x1x8x256xf32> to vector<8x256xf32>
    %cst_4 = arith.constant dense<0.000000e+00> : vector<8xf32>
    %4 = vector.multi_reduction <add>, %3, %cst_4 [1] : vector<8x256xf32> to vector<8xf32>
    %5 = vector.shape_cast %4 : vector<8xf32> to vector<8x1xf32>
    %6 = arith.addf %0, %5 : vector<8x1xf32>
    %7 = arith.mulf %3, %3 : vector<8x256xf32>
    %cst_5 = arith.constant dense<0.000000e+00> : vector<8xf32>
    %8 = vector.multi_reduction <add>, %7, %cst_5 [1] : vector<8x256xf32> to vector<8xf32>
    %9 = vector.shape_cast %8 : vector<8xf32> to vector<8x1xf32>
    %10 = arith.addf %1, %9 : vector<8x1xf32>
    %c0_6 = arith.constant 0 : index
    %c0_7 = arith.constant 0 : index
    %c0_8 = arith.constant 0 : index
    %c256 = arith.constant 256 : index
    %11 = vector.load %arg2[%c0_6, %c0_7, %c0_8, %c256] : memref<1x1x8x512xf32, #tpu.memory_space<vmem>>, vector<1x1x8x256xf32>
    %12 = vector.shape_cast %11 : vector<1x1x8x256xf32> to vector<8x256xf32>
    %cst_9 = arith.constant dense<0.000000e+00> : vector<8xf32>
    %13 = vector.multi_reduction <add>, %12, %cst_9 [1] : vector<8x256xf32> to vector<8xf32>
    %14 = vector.shape_cast %13 : vector<8xf32> to vector<8x1xf32>
    %15 = arith.addf %6, %14 : vector<8x1xf32>
    %16 = arith.mulf %12, %12 : vector<8x256xf32>
    %cst_10 = arith.constant dense<0.000000e+00> : vector<8xf32>
    %17 = vector.multi_reduction <add>, %16, %cst_10 [1] : vector<8x256xf32> to vector<8xf32>
    %18 = vector.shape_cast %17 : vector<8xf32> to vector<8x1xf32>
    %19 = arith.addf %10, %18 : vector<8x1xf32>
    %cst_11 = arith.constant 0.001953125 : f32
    %20 = vector.broadcast %cst_11 : f32 to vector<8x1xf32>
    %21 = arith.mulf %15, %20 : vector<8x1xf32>
    %22 = arith.mulf %15, %21 : vector<8x1xf32>
    %23 = arith.subf %19, %22 : vector<8x1xf32>
    %cst_12 = arith.constant 0.00195694715 : f32
    %24 = vector.broadcast %cst_12 : f32 to vector<8x1xf32>
    %25 = arith.mulf %23, %24 : vector<8x1xf32>
    %cst_13 = arith.constant 0.000000e+00 : f32
    %26 = vector.broadcast %cst_13 : f32 to vector<8x1xf32>
    %27 = arith.maximumf %25, %26 : vector<8x1xf32>
    %cst_14 = arith.constant 9.99999974E-6 : f32
    %28 = vector.broadcast %cst_14 : f32 to vector<8x1xf32>
    %29 = arith.addf %27, %28 : vector<8x1xf32>
    %30 = math.rsqrt %29 : vector<8x1xf32>
    %c0_15 = arith.constant 0 : index
    %c0_16 = arith.constant 0 : index
    %c0_17 = arith.constant 0 : index
    %31 = vector.load %arg3[%c0_15, %c0_16, %c0_17] : memref<1x8x2xf32, #tpu.memory_space<vmem>>, vector<1x8x2xf32>
    %32 = vector.shape_cast %31 : vector<1x8x2xf32> to vector<8x2xf32>
    %c0_18 = arith.constant 0 : index
    %c0_19 = arith.constant 0 : index
    %c0_20 = arith.constant 0 : index
    %33 = vector.load %arg4[%c0_18, %c0_19, %c0_20] : memref<1x8x2xf32, #tpu.memory_space<vmem>>, vector<1x8x2xf32>
    %34 = vector.shape_cast %33 : vector<1x8x2xf32> to vector<8x2xf32>
    %35 = vector.extract_strided_slice %32 {offsets = [0, 0], sizes = [8, 1], strides = [1, 1]} : vector<8x2xf32> to vector<8x1xf32>
    %36 = arith.mulf %35, %30 : vector<8x1xf32>
    %37 = vector.extract_strided_slice %34 {offsets = [0, 0], sizes = [8, 1], strides = [1, 1]} : vector<8x2xf32> to vector<8x1xf32>
    %38 = arith.mulf %21, %36 : vector<8x1xf32>
    %39 = arith.subf %37, %38 : vector<8x1xf32>
    %c0_21 = arith.constant 0 : index
    %c0_22 = arith.constant 0 : index
    %c0_23 = arith.constant 0 : index
    %c0_24 = arith.constant 0 : index
    %40 = vector.load %arg2[%c0_21, %c0_22, %c0_23, %c0_24] : memref<1x1x8x512xf32, #tpu.memory_space<vmem>>, vector<1x1x8x256xf32>
    %41 = vector.shape_cast %40 : vector<1x1x8x256xf32> to vector<8x256xf32>
    %42 = vector.broadcast %36 : vector<8x1xf32> to vector<8x256xf32>
    %43 = arith.mulf %41, %42 : vector<8x256xf32>
    %44 = vector.broadcast %39 : vector<8x1xf32> to vector<8x256xf32>
    %45 = arith.addf %43, %44 : vector<8x256xf32>
    %c0_25 = arith.constant 0 : index
    %c0_26 = arith.constant 0 : index
    %c0_27 = arith.constant 0 : index
    %c0_28 = arith.constant 0 : index
    %46 = vector.load %arg5[%c0_25, %c0_26, %c0_27, %c0_28] : memref<1x1x8x512xf32, #tpu.memory_space<vmem>>, vector<1x1x8x256xf32>
    %47 = vector.shape_cast %46 : vector<1x1x8x256xf32> to vector<8x256xf32>
    %48 = vector.shape_cast %45 : vector<8x256xf32> to vector<1x1x8x256xf32>
    tpu.vector_store %arg5[%c0_25, %c0_26, %c0_27, %c0_28], %48 {strides = array<i32>} : memref<1x1x8x512xf32, #tpu.memory_space<vmem>>, vector<1x1x8x256xf32>,
    %49 = vector.extract_strided_slice %32 {offsets = [0, 1], sizes = [8, 1], strides = [1, 1]} : vector<8x2xf32> to vector<8x1xf32>
    %50 = arith.mulf %49, %30 : vector<8x1xf32>
    %51 = vector.extract_strided_slice %34 {offsets = [0, 1], sizes = [8, 1], strides = [1, 1]} : vector<8x2xf32> to vector<8x1xf32>
    %52 = arith.mulf %21, %50 : vector<8x1xf32>
    %53 = arith.subf %51, %52 : vector<8x1xf32>
    %c0_29 = arith.constant 0 : index
    %c0_30 = arith.constant 0 : index
    %c0_31 = arith.constant 0 : index
    %c256_32 = arith.constant 256 : index
    %54 = vector.load %arg2[%c0_29, %c0_30, %c0_31, %c256_32] : memref<1x1x8x512xf32, #tpu.memory_space<vmem>>, vector<1x1x8x256xf32>
    %55 = vector.shape_cast %54 : vector<1x1x8x256xf32> to vector<8x256xf32>
    %56 = vector.broadcast %50 : vector<8x1xf32> to vector<8x256xf32>
    %57 = arith.mulf %55, %56 : vector<8x256xf32>
    %58 = vector.broadcast %53 : vector<8x1xf32> to vector<8x256xf32>
    %59 = arith.addf %57, %58 : vector<8x256xf32>
    %c0_33 = arith.constant 0 : index
    %c0_34 = arith.constant 0 : index
    %c0_35 = arith.constant 0 : index
    %c256_36 = arith.constant 256 : index
    %60 = vector.load %arg5[%c0_33, %c0_34, %c0_35, %c256_36] : memref<1x1x8x512xf32, #tpu.memory_space<vmem>>, vector<1x1x8x256xf32>
    %61 = vector.shape_cast %60 : vector<1x1x8x256xf32> to vector<8x256xf32>
    %62 = vector.shape_cast %59 : vector<8x256xf32> to vector<1x1x8x256xf32>
    tpu.vector_store %arg5[%c0_33, %c0_34, %c0_35, %c256_36], %62 {strides = array<i32>} : memref<1x1x8x512xf32, #tpu.memory_space<vmem>>, vector<1x1x8x256xf32>,
    return
  }
  func.func @transform_0(%arg0: i32, %arg1: i32) -> (i32, i32, i32, i32) {
    %c0_i32 = arith.constant 0 : i32
    %c0_i32_0 = arith.constant 0 : i32
    %c0_i32_1 = arith.constant 0 : i32
    return %arg1, %arg0, %c0_i32, %c0_i32_0 : i32, i32, i32, i32
  }
  func.func @transform_1(%arg0: i32, %arg1: i32) -> (i32, i32, i32) {
    %c0_i32 = arith.constant 0 : i32
    %c0_i32_0 = arith.constant 0 : i32
    %c0_i32_1 = arith.constant 0 : i32
    return %arg0, %c0_i32, %c0_i32_0 : i32, i32, i32
  }
  func.func @transform_2(%arg0: i32, %arg1: i32) -> (i32, i32, i32) {
    %c0_i32 = arith.constant 0 : i32
    %c0_i32_0 = arith.constant 0 : i32
    %c0_i32_1 = arith.constant 0 : i32
    return %arg0, %c0_i32, %c0_i32_0 : i32, i32, i32
  }
  func.func @transform_3(%arg0: i32, %arg1: i32) -> (i32, i32, i32, i32) {
    %c0_i32 = arith.constant 0 : i32
    %c0_i32_0 = arith.constant 0 : i32
    %c0_i32_1 = arith.constant 0 : i32
    return %arg1, %arg0, %c0_i32, %c0_i32_0 : i32, i32, i32, i32
  }
}

</mosaic_0001>

<bundles_post_ra>
// kernel: tpu_custom_call.1
= control target key start
LH: loop header
LB: loop body
LE: loop exit
PB: predicated region body
PF: predicated region fallthrough
CT: control target
= control target key end

     0   :  { %8 = vsyncpa [#allocation3], 0  ;;  %s871_s0 = inlined_call_operand.hbm [shape: f32[2,2,8,512], index: 0, kind: input, shape index: {}]   ;;  %s872_s1 = inlined_call_operand.vmem [shape: f32[2,8,2], index: 1, kind: input, shape index: {}]   ;;  %s873_s2 = inlined_call_operand.vmem [shape: f32[2,8,2], index: 2, kind: input, shape index: {}]   ;;  %s874_s3 = inlined_call_operand.hbm [shape: f32[2,2,8,512], index: 3, kind: output, shape index: {}]  }
   0x1   :  { %10 = vsyncpa [#allocation3 + $0x1], 0 }
   0x2   :  { %11 = vsyncpa [#allocation4], 0 }
   0x3   :  { %13 = vsyncpa [#allocation4 + $0x1], 0  ;;  %s691_s12 = smov 0   ;;  %s693_s13 = smov 0  }
   0x4   :  { %s695_s14 = smov 0   ;;  %s697_s15 = smov 0  }
   0x5   :  { %s699_s16 = smov 0   ;;  %s701_s17 = smov 0  }
   0x6   :  { %s703_s18 = smov 0   ;;  %s705_s19 = smov 0  }
   0x7 LB: > { %s435_s20 = sadd.s32 4294967295, %s665_s19   ;;  %s436_s21 = sadd.s32 4294967294, %s665_s19   ;;  %s665_s19 = sphi %s705_s19, %s19_s19   ;;  %s661_s18 = sphi %s703_s18, %s890_s18   ;;  %s657_s17 = sphi %s701_s17, %s889_s17   ;;  %s653_s16 = sphi %s699_s16, %s888_s16   ;;  %s649_s15 = sphi %s697_s15, %s887_s15   ;;  %s645_s14 = sphi %s695_s14, %s886_s14   ;;  %s641_s13 = sphi %s693_s13, %s885_s13   ;;  %s637_s12 = sphi %s691_s12, %s884_s12  }
   0x8   : > { %s28_s22 = sadd.s32 1, %s657_s17  ;;  %s31_s23 = sadd.s32 1, %s661_s18 }
   0x9   : > { %p29_p0 = scmp.ge.s32.totalorder %s28_s22, 2  ;;  %s40_s24 = sadd.s32 1, %s645_s14 }
   0xa   : > { %p47_p1 = scmp.ne.s32.totalorder %s645_s14, %s641_s13  ;;  %p48_p2 = scmp.eq.s32.totalorder %s665_s19, 0 }
   0xb   : > { %s892_s22 = smov (%p29_p0, %s28_s22), 0  ;;  %s894_s23 = smov (!%p29_p0, %s31_s23), %s661_s18 }
   0xc   : > { %s35_s25 = ssub.s32 %s657_s17, %s892_s22  ;;  %p744_p3 = por %p48_p2, %p47_p1 }
   0xd   : > { %p33_p4 = scmp.ge.s32.totalorder %s894_s23, 2  ;;  %p53_p5 = scmp.ne.s32.totalorder %s641_s13, %s637_s12 }
   0xe   : > { %p54_p6 = scmp.eq.s32.totalorder %s435_s20, 0  ;;  %p131_p7 = scmp.eq.s32.totalorder %s435_s20, 3 }
   0xf   : > { %s896_s23 = smov (%p33_p4, %s894_s23), 0  ;;  %p137_p10 = scmp.eq.s32.totalorder %s436_s21, 3 }
  0x10   : > { %877 = sst [smem:[#allocation8_spill]] %s896_s23  ;;  %p752_p8 = por %p54_p6, %p53_p5 }
  0x11   : > { %p756_p9 = por %p131_p7, %p47_p1  ;;  %s36_s29 = ssub.s32 %s661_s18, %s896_s23 }
  0x12   : > { %s37_s30 = sor.u32 %s36_s29, %s35_s25  ;;  %p762_p12 = por %p137_p10, %p53_p5 }
  0x13   : > { %p38_p11 = scmp.eq.s32.totalorder %s37_s30, 0  ;;  %p466_p13 = scmp.lt.s32.totalorder %s665_s19, 4 }
  0x14   : > { %s880_s4 = scalar_select %p762_p12, 1, 0 }
  0x15   : > { %s157_s5 = sand.u32 1, %s645_s14   ;;  %s440_s8 = sshll.u32 %s661_s18, 2 }
  0x16   : > { %s769_s6 = scalar_select %p38_p11, %s645_s14, %s40_s24  }
  0x17   : > { %s439_s7 = sshll.u32 %s157_s5, 5  ;;  %s441_s9 = sshll.u32 %s657_s17, 3 }
  0x18   : > { %s161_s10 = scalar_lea.vmem [#allocation2], %s439_s7  ;;  %s167_s20 = sadd.s32 %s441_s9, %s440_s8 }
  0x19   : > { %s171_s11 = sshll.u32 %s161_s10, 4  ;;  %s442_s21 = sshll.u32 %s167_s20, 7  ;;  %s172_s11 = int_to_ptr.vmem [resolvable:$true] %s171_s11 }
  0x1a   : > { %p775_p0 = pnand %p466_p13, %p744_p3  ;;  %s169_s23 = scalar_lea.hbm %s871_s0, %s442_s21 }
  0x1b   : > { %p443_p1 = scmp.ge.s32.totalorder %s665_s19, 1  ;;  %p190_p2 = scmp.lt.s32.totalorder %s665_s19, 5 }
  0x1c   : > { %s158_s24 = scalar_lea.sflag [#allocation3], %s157_s5  ;;  %p543_p4 = pneg %p775_p0 }
  0x1d   : > { %s554_s7 = scalar_lea.vmem %s172_s11, 512  ;;  %s667_s8 = smov [#allocation2]  }
  0x1e   : > { %p555_p5 = scmp.ne.s32.totalorder %s172_s11, %s554_s7  ;;  %s559_s26 = sshll.u32 %s667_s8, 4  ;;  %s560_s26 = int_to_ptr.vmem [resolvable:$false] %s559_s26 }
  0x1f   : > { %s561_s9 = scalar_lea.vmem %s560_s26, 1024  ;;  %p562_p3 = scmp.lt.s32.totalorder %s172_s11, %s560_s26 }
  0x20   : > { %p557_p6 = pnand %p555_p5, %p543_p4  ;;  %p563_p10 = scmp.lt.s32.totalorder %s561_s9, %s554_s7 }
  0x22   : > { %p558_p7 = pneg %p557_p6  ;;  %p564_p11 = por %p563_p10, %p562_p3 }
  0x24   : > { %p565_p13 = pnand %p564_p11, %p558_p7 }
  0x26   : > { %568 = shalt.err (!%p565_p13)
}
  0x27   : > { %461 = dma.hbm_to_vmem [thread:$0]  (!%p775_p0), %s169_s23, 512, %s172_s11, %s158_s24  }
  0x28   : > { %p191_p12 = pnand %p443_p1, %p190_p2 }
  0x29   : > { %s793_s5 = sand.u32 (!%p191_p12), 1, %s641_s13  }
  0x2a   : > { %194 = sbr.rel (%p191_p12) target bundleno = 372 (0x174), region = 32  ;;  %s444_s10 = sshll.u32 (!%p191_p12), %s793_s5, 5 }
  0x2b   : > { %s197_s20 = scalar_lea.sflag (!%p191_p12), [#allocation3], %s793_s5  ;;  %s200_s21 = scalar_lea.vmem (!%p191_p12), [#allocation2], %s444_s10 }
  0x2f   : > { %628 = dma.done.wait (%p752_p8), %s197_s20, 512  }
  0x30   : > { %630 = vsyncadd (%p752_p8), %s197_s20, 4294966784  ;;  %v239_v0 = vld [vmem:[%s200_s21] sm:$0xff]  ;;  %v240_v1 = vld [vmem:[%s200_s21 + $0x8] sm:$0xff]  ;;  %v668_v12 = vmov 1   ;;  %v669_v13 = vmov 0   ;;  %p231_p8 = scmp.lt.s32.totalorder %s653_s16, 1 }
  0x31   : > { %v803_v2 = vld [vmem:[%s200_s21 + $0x10] sm:$0xff]  ;;  %v241_v3 = vadd.f32 %v240_v1, %v239_v0  ;;  %v245_v4 = vmul.f32 %v239_v0, %v239_v0  ;;  %v246_v5 = vmul.f32 %v240_v1, %v240_v1  ;;  %v252_v6 = vld [vmem:[%s200_s21 + $0x18] sm:$0xff]  ;;  %535 = vset.pattern.permute.xlu1 %v668_v12  ;;  %534 = vset.pattern.permute.xlu0 %v669_v13  ;;  %s449_s8 = sshll.u32 %s653_s16, 2  ;;  %s450_s26 = sshll.u32 %s649_s15, 3 }
  0x32   : > { %v257_v7 = vmul.f32 %v803_v2, %v803_v2  ;;  %v258_v8 = vmul.f32 %v252_v6, %v252_v6  ;;  %v253_v10 = vadd.f32 %v252_v6, %v803_v2  ;;  %s232_s23 = scalar_select %p231_p8, %s653_s16, 1 }
  0x33   : > { %242 = vadd.xlane.f32.xlu0 %v241_v3  ;;  %v247_v9 = vadd.f32 %v246_v5, %v245_v4  ;;  %s320_s9 = sadd.s32 %s450_s26, %s449_s8  ;;  %s230_s20 = scalar_lea.vmem [#allocation5], %s444_s10 }
  0x34   : > { %v259_v11 = vadd.f32 %v258_v8, %v257_v7  ;;  %s446_s27 = sshll.u32 %s232_s23, 3  ;;  %s451_s21 = sshll.u32 %s320_s9, 7 }
  0x35   : > { %248 = vadd.xlane.f32.xlu1 %v247_v9  ;;  %s234_s29 = scalar_lea.vmem %s872_s1, %s446_s27  ;;  %s238_s7 = scalar_lea.vmem %s873_s2, %s446_s27 }
  0x36   : > { %v270_v26 = vld [vmem:[%s234_s29] sm:$0xff]  ;;  %s324_s23 = sshll.u32 %s230_s20, 4  ;;  %s824_s27 = scalar_lea.hbm %s874_s3, %s451_s21  ;;  %s325_s23 = int_to_ptr.vmem [resolvable:$true] %s324_s23 }
  0x37   : > { %254 = vadd.xlane.f32.xlu0 %v253_v10  ;;  %v271_v29 = vld [vmem:[%s238_s7] sm:$0xff]  ;;  %s308_s10 = scalar_lea.sflag [#allocation4], %s793_s5  ;;  %s569_s11 = scalar_lea.vmem %s325_s23, 512 }
  0x38   : > { %p570_p12 = scmp.ne.s32.totalorder %s325_s23, %s569_s11  ;;  %s670_s25 = smov [#allocation5]  }
  0x39   : > { %260 = vadd.xlane.f32.xlu1 %v259_v11  ;;  %s573_s29 = sshll.u32 %s670_s25, 4  ;;  %s574_s29 = int_to_ptr.vmem [resolvable:$false] %s573_s29 }
  0x3a   : > { %p571_p0 = pnand %p570_p12, %p756_p9  ;;  %s575_s30 = scalar_lea.vmem %s574_s29, 1024 }
  0x3b   : > { %p576_p2 = scmp.lt.s32.totalorder %s325_s23, %s574_s29  ;;  %p577_p4 = scmp.lt.s32.totalorder %s575_s30, %s569_s11 }
  0x3c   : > { %p572_p1 = pneg %p571_p0 }
  0x3d   : > { %p578_p5 = por %p577_p4, %p576_p2 }
  0x3f   : > { %p579_p6 = pnand %p578_p5, %p572_p1 }
  0xbc   : > { %v243_v14 = vpop.xlane.xlu0 %242 }
  0xbe   : > { %v249_v15 = vpop.xlane.xlu1 %248 }
  0xc0   : > { %v255_v16 = vpop.xlane.xlu0 %254 }
  0xc1   : > { %v256_v17 = vadd.f32 %v255_v16, %v243_v14 }
  0xc2   : > { %v261_v18 = vpop.xlane.xlu1 %260 }
  0xc3   : > { %v263_v19 = vmul.f32 0.001953125, %v256_v17  ;;  %v262_v21 = vadd.f32 %v261_v18, %v249_v15 }
  0xc5   : > { %v264_v20 = vmul.f32 %v263_v19, %v256_v17 }
  0xc7   : > { %v265_v22 = vsub.f32 %v262_v21, %v264_v20 }
  0xc9   : > { %v266_v23 = vmul.f32 0.0019569471, %v265_v22 }
  0xcb   : > { %v267_v24 = vmax.f32 %v266_v23, 0.0 }
  0xcd   : > { %v268_v25 = vadd.f32 1e-05, %v267_v24 }
  0xcf   : > { %539 = vrsqrt.f32 %v268_v25 }
  0xdc   : > { %v540_v27 = vpop.eup %539 }
  0xdd   : > { %v272_v28 = vmul.f32 %v540_v27, %v270_v26 }
  0xdf   : > { %294 = vperm.xlu1 %535, %v272_v28   ;;  %277 = vperm.xlu0 %534, %v272_v28   ;;  %v273_v30 = vmul.f32 %v272_v28, %v263_v19 }
  0xe1   : > { %v274_v31 = vsub.f32 %v271_v29, %v273_v30 }
  0xe3   : > { %536 = vset.pattern.permute.xlu1 %v669_v13  ;;  %538 = vset.pattern.permute.xlu0 %v668_v12 }
  0xe4   : > { %284 = vperm.xlu1 %536, %v274_v31  }
  0xe8   : > { %537 = vset.pattern.permute.xlu1 %v668_v12 }
  0xe9   : > { %300 = vperm.xlu1 %537, %v274_v31  }
 0x15a   : > { %v295_v32 = vpop.permute.xlu1 %294  ;;  %v278_v33 = vpop.permute.xlu0 %277 }
 0x15b   : > { %v280_v34 = vmul.f32 %v278_v33, %v239_v0  ;;  %v281_v35 = vmul.f32 %v278_v33, %v240_v1  ;;  %v297_v39 = vmul.f32 %v295_v32, %v803_v2  ;;  %v298_v40 = vmul.f32 %v295_v32, %v252_v6 }
 0x15f   : > { %v285_v36 = vpop.permute.xlu1 %284 }
 0x160   : > { %v287_v37 = vadd.f32 %v285_v36, %v280_v34  ;;  %v288_v38 = vadd.f32 %v285_v36, %v281_v35 }
 0x162   : > { %289 = vst [vmem:[%s230_s20] sm:$0xff] %v287_v37  ;;  %290 = vst [vmem:[%s230_s20 + $0x8] sm:$0xff] %v288_v38 }
 0x164   : > { %v301_v41 = vpop.permute.xlu1 %300 }
 0x165   : > { %v303_v42 = vadd.f32 %v301_v41, %v297_v39  ;;  %v304_v43 = vadd.f32 %v301_v41, %v298_v40 }
 0x167   : > { %305 = vst [vmem:[%s230_s20 + $0x10] sm:$0xff] %v303_v42  ;;  %306 = vst [vmem:[%s230_s20 + $0x18] sm:$0xff] %v304_v43 }
 0x168   : > { %582 = shalt.err (!%p579_p6)
}
 0x169   : > { %s583_s24 = scalar_lea.hbm %s824_s27, 512  ;;  %s587_s8 = scalar_lea.hbm %s874_s3, 2048 }
 0x16a   : > { %p584_p7 = scmp.ne.s32.totalorder %s824_s27, %s583_s24  ;;  %p588_p11 = scmp.lt.s32.totalorder %s824_s27, %s874_s3 }
 0x16b   : > { %p589_p13 = scmp.lt.s32.totalorder %s587_s8, %s583_s24 }
 0x16c   : > { %p585_p3 = pnand %p584_p7, %p756_p9 }
 0x16d   : > { %p590_p8 = por %p589_p13, %p588_p11 }
 0x16e   : > { %p586_p10 = pneg %p585_p3 }
 0x170   : > { %p591_p12 = pnand %p590_p8, %p586_p10 }
 0x172   : > { %594 = shalt.err (!%p591_p12)
}
 0x173   : > { %456 = dma.vmem_to_hbm [thread:$0]  (%p756_p9), %s325_s23, 512, %s824_s27, %s308_s10  }
 0x174 PF: > { %p467_p0 = scmp.ge.s32.totalorder %s665_s19, 2  ;;  %s336_s20 = sand.u32 1, %s637_s12  }
 0x175   : > { %p882_p1 = scmp.ne.s32.totalorder %s880_s4, 0  ;;  %s337_s21 = scalar_lea.sflag [#allocation4], %s336_s20 }
 0x177   : > { %p463_p2 = pnand %p467_p0, %p882_p1 }
 0x179   : > { %p464_p4 = pneg %p463_p2 }
 0x17b   : > { %632 = dma.done.wait (%p464_p4), %s337_s21, 512  }
 0x17c   : > { %634 = vsyncadd (%p464_p4), %s337_s21, 4294966784  ;;  %s19_s19 = sadd.s32 1, %s665_s19   ;;  %s883_s28 = sld [smem:[#allocation8_spill]] }
 0x17d   : > { %p16_p5 = scmp.ge.s32.totalorder %s19_s19, 6   ;;  %s884_s12 = smov %s641_s13 }
 0x17e   : > { %s885_s13 = smov %s645_s14  ;;  %s886_s14 = smov %s769_s6 }
 0x17f   : > { %s887_s15 = smov %s657_s17  ;;  %s888_s16 = smov %s661_s18 }
 0x180   : > { %s889_s17 = smov %s892_s22  ;;  %18 = sbr.rel (!%p16_p5) target bundleno = 7 (0x7), region = 83 }
 0x182   : > { %s890_s18 = smov %s883_s28 }
 0x185   :  { %342 = vsyncpa [#allocation3], 1 }
 0x186   :  { %344 = vsyncpa [#allocation3 + $0x1], 1 }
 0x187   :  { %345 = vsyncpa [#allocation4], 1 }
 0x188   :  { %347 = vsyncpa [#allocation4 + $0x1], 1 }

</bundles_post_ra>
